<compile_context>
chip_gen: v6e
topology: v6e:2x2x1
jax: 0.10.0
libtpu: 0.0.40
codegen_flags: <defaults>
</compile_context>

<pallas_src>
import jax
import jax.numpy as jnp
from jax.experimental import pallas as pl
from jax.experimental.pallas import tpu as pltpu

N_EMBED = 8
# nn.RMSNorm(eps=None) defaults to torch.finfo(float32).eps
RMS_EPS = 1.1920928955078125e-07
LANES = 128


def mynn_kernel(coef_ref, x_ref, o_ref):
    # coef_ref: SMEM (6,) f32 = [a, b, c, p, q, b2]
    # x_ref / o_ref: VMEM (TILE_R, 128) f32  (lane-dense token layout)
    x = x_ref[...]
    a = coef_ref[0]
    b = coef_ref[1]
    c = coef_ref[2]
    p = coef_ref[3]
    q = coef_ref[4]
    b2 = coef_ref[5]
    ms = (a * x + b) * x + c                      # mean_j((w1_j*x + b1_j)^2)
    o_ref[...] = (p * x + q) * jax.lax.rsqrt(ms + RMS_EPS) + b2


def mynn_forward(x, params, *, tile_r=2048):
    B, S = x.shape
    M = B * S

    # --- collapse Linear(1,8) -> RMSNorm(8) -> Linear(8,1) to 6 scalars ---
    w1 = params["w1"].reshape(-1).astype(jnp.float32)     # val_embed.weight (8,1)
    b1 = params["b1"].reshape(-1).astype(jnp.float32)     # val_embed.bias   (8,)
    g = params["g"].reshape(-1).astype(jnp.float32)       # RMSNorm weight   (8,)
    w2 = params["w2"].reshape(-1).astype(jnp.float32)     # out.weight       (1,8)
    b2 = params["b2"].reshape(-1).astype(jnp.float32)[0]  # out.bias
    a = jnp.mean(w1 * w1)
    b = 2.0 * jnp.mean(w1 * b1)
    c = jnp.mean(b1 * b1)
    p = jnp.sum(w1 * g * w2)
    q = jnp.sum(b1 * g * w2)
    coef = jnp.stack([a, b, c, p, q, b2])                 # (6,) f32 -> SMEM

    # --- lane-dense layout: (rows, 128), padded so the tile divides evenly ---
    rows = (M + LANES - 1) // LANES
    if rows <= tile_r:
        tile = max(8, ((rows + 7) // 8) * 8)               # sublane multiple
        rows_p = tile
    else:
        tile = tile_r
        rows_p = ((rows + tile - 1) // tile) * tile
    M_pad = rows_p * LANES

    x_flat = x.reshape(-1).astype(jnp.float32)
    if M_pad != M:
        x_flat = jnp.pad(x_flat, (0, M_pad - M))
    x2d = x_flat.reshape(rows_p, LANES)

    out2d = pl.pallas_call(
        mynn_kernel,
        out_shape=jax.ShapeDtypeStruct((rows_p, LANES), jnp.float32),
        grid_spec=pltpu.PrefetchScalarGridSpec(
            num_scalar_prefetch=0,
            grid=(rows_p // tile,),
            in_specs=[
                pl.BlockSpec(memory_space=pltpu.MemorySpace.SMEM),   # coef
                pl.BlockSpec((tile, LANES), lambda i: (i, 0)),       # x tile
            ],
            out_specs=pl.BlockSpec((tile, LANES), lambda i: (i, 0)),
        ),
        compiler_params=pltpu.CompilerParams(
            dimension_semantics=("parallel",)),
    )(coef, x2d)

    return out2d.reshape(-1)[:M].reshape(B, S, 1)


def mynn_ref(x, params):
    # pure-JAX reference of the PyTorch forward (un-collapsed math)
    e = x[..., None] * params["w1"].reshape(-1) + params["b1"]          # (B, S, 8)
    ms = jnp.mean(e * e, axis=-1, keepdims=True)
    n = e * jax.lax.rsqrt(ms + RMS_EPS) * params["g"]
    return jnp.sum(n * params["w2"].reshape(-1), axis=-1, keepdims=True) + params["b2"]


if __name__ == "__main__":
    key = jax.random.PRNGKey(0)
    k1, k2, k3, k4, kx = jax.random.split(key, 5)

    # deterministic synthetic parameters (PyTorch-like init scales; RMSNorm weight = ones)
    params = {
        "w1": jax.random.uniform(k1, (N_EMBED, 1), jnp.float32, -1.0, 1.0),          # Linear(1,8).weight
        "b1": jax.random.uniform(k2, (N_EMBED,), jnp.float32, -1.0, 1.0),             # Linear(1,8).bias
        "g": jnp.ones((N_EMBED,), jnp.float32),                                       # RMSNorm(8).weight
        "w2": jax.random.uniform(k3, (1, N_EMBED), jnp.float32,
                                 -1.0 / (N_EMBED ** 0.5), 1.0 / (N_EMBED ** 0.5)),    # Linear(8,1).weight
        "b2": jax.random.uniform(k4, (1,), jnp.float32,
                                 -1.0 / (N_EMBED ** 0.5), 1.0 / (N_EMBED ** 0.5)),    # Linear(8,1).bias
    }

    # small primary shape + one ragged shape (padding path) + one multi-tile shape
    shapes = [(2, 128), (3, 100), (256, 2048)]
    for i, (B, S) in enumerate(shapes):
        x = jax.random.normal(jax.random.fold_in(kx, i), (B, S), jnp.float32)
        out = jax.block_until_ready(mynn_forward(x, params))
        ref = mynn_ref(x, params)
        assert out.shape == (B, S, 1), out.shape
        err = float(jnp.max(jnp.abs(out - ref)))
        assert jnp.allclose(out, ref, atol=1e-5, rtol=1e-5), (B, S, err)

    print("KERNEL_OK")
</pallas_src>

<mosaic_0001>
module attributes {stable_mosaic.version = 11 : i64} {
  func.func @mynn_kernel(%arg0: i32, %arg1: memref<6xf32, #tpu.memory_space<smem>>, %arg2: memref<8x128xf32, #tpu.memory_space<vmem>>, %arg3: memref<8x128xf32, #tpu.memory_space<vmem>>) attributes {dimension_semantics = [#tpu.dimension_semantics<parallel>], iteration_bounds = array<i64: 1>, scalar_prefetch = 0 : i64, scratch_operands = 0 : i64, tpu.core_type = #tpu.core_type<tc>, window_params = [{transform_indices = @transform_0, window_bounds = array<i64: 6>}, {transform_indices = @transform_1, window_bounds = array<i64: 8, 128>}, {transform_indices = @transform_2, window_bounds = array<i64: 8, 128>}]} {
    %c0 = arith.constant 0 : index
    %c0_0 = arith.constant 0 : index
    %0 = vector.load %arg2[%c0, %c0_0] : memref<8x128xf32, #tpu.memory_space<vmem>>, vector<8x128xf32>
    %c0_1 = arith.constant 0 : index
    %1 = memref.load %arg1[%c0_1] : memref<6xf32, #tpu.memory_space<smem>>
    %c1 = arith.constant 1 : index
    %2 = memref.load %arg1[%c1] : memref<6xf32, #tpu.memory_space<smem>>
    %c2 = arith.constant 2 : index
    %3 = memref.load %arg1[%c2] : memref<6xf32, #tpu.memory_space<smem>>
    %c3 = arith.constant 3 : index
    %4 = memref.load %arg1[%c3] : memref<6xf32, #tpu.memory_space<smem>>
    %c4 = arith.constant 4 : index
    %5 = memref.load %arg1[%c4] : memref<6xf32, #tpu.memory_space<smem>>
    %c5 = arith.constant 5 : index
    %6 = memref.load %arg1[%c5] : memref<6xf32, #tpu.memory_space<smem>>
    %7 = vector.broadcast %1 : f32 to vector<8x128xf32>
    %8 = arith.mulf %7, %0 : vector<8x128xf32>
    %9 = vector.broadcast %2 : f32 to vector<8x128xf32>
    %10 = arith.addf %8, %9 : vector<8x128xf32>
    %11 = arith.mulf %10, %0 : vector<8x128xf32>
    %12 = vector.broadcast %3 : f32 to vector<8x128xf32>
    %13 = arith.addf %11, %12 : vector<8x128xf32>
    %14 = vector.broadcast %4 : f32 to vector<8x128xf32>
    %15 = arith.mulf %14, %0 : vector<8x128xf32>
    %16 = vector.broadcast %5 : f32 to vector<8x128xf32>
    %17 = arith.addf %15, %16 : vector<8x128xf32>
    %cst = arith.constant 1.1920929E-7 : f32
    %18 = vector.broadcast %cst : f32 to vector<8x128xf32>
    %19 = arith.addf %13, %18 : vector<8x128xf32>
    %20 = math.rsqrt %19 : vector<8x128xf32>
    %21 = arith.mulf %17, %20 : vector<8x128xf32>
    %22 = vector.broadcast %6 : f32 to vector<8x128xf32>
    %23 = arith.addf %21, %22 : vector<8x128xf32>
    %c0_2 = arith.constant 0 : index
    %c0_3 = arith.constant 0 : index
    %24 = vector.load %arg3[%c0_2, %c0_3] : memref<8x128xf32, #tpu.memory_space<vmem>>, vector<8x128xf32>
    tpu.vector_store %arg3[%c0_2, %c0_3], %23 {strides = array<i32>} : memref<8x128xf32, #tpu.memory_space<vmem>>, vector<8x128xf32>,
    return
  }
  func.func @transform_0(%arg0: i32) -> i32 {
    %c0_i32 = arith.constant 0 : i32
    %c0_i32_0 = arith.constant 0 : i32
    return %c0_i32 : i32
  }
  func.func @transform_1(%arg0: i32) -> (i32, i32) {
    %c0_i32 = arith.constant 0 : i32
    %c0_i32_0 = arith.constant 0 : i32
    return %arg0, %c0_i32 : i32, i32
  }
  func.func @transform_2(%arg0: i32) -> (i32, i32) {
    %c0_i32 = arith.constant 0 : i32
    %c0_i32_0 = arith.constant 0 : i32
    return %arg0, %c0_i32 : i32, i32
  }
}

</mosaic_0001>

<bundles_post_ra>
// kernel: tpu_custom_call.1
= control target key start
LH: loop header
LB: loop body
LE: loop exit
PB: predicated region body
PF: predicated region fallthrough
CT: control target
= control target key end

     0   :  { %7 = vsyncpa [#allocation5], 0  ;;  %s166_s0 = inlined_call_operand.hbm [shape: f32[6], index: 0, kind: input, shape index: {}]   ;;  %s167_s1 = inlined_call_operand.hbm [shape: f32[8,128], index: 1, kind: input, shape index: {}]   ;;  %s168_s2 = inlined_call_operand.hbm [shape: f32[8,128], index: 2, kind: output, shape index: {}]  }
   0x1   :  { %8 = vsyncpa [#allocation3], 0 }
   0x2   :  { %9 = vsyncpa [#allocation4], 0  ;;  %s139_s9 = smov [#allocation2]   ;;  %s140_s12 = smov [#allocation6]  }
   0x3   :  { %17 = dma.hbm_to_smem %s166_s0, 16, %s139_s9, [#allocation5]  }
   0x4   :  { %s24_s13 = sshll.u32 %s140_s12, 4  ;;  %s25_s13 = int_to_ptr.vmem [resolvable:$true] %s24_s13 }
   0x5   :  { %s101_s14 = scalar_lea.vmem %s25_s13, 128  ;;  %p106_p1 = scmp.lt.s32.totalorder %s25_s13, %s25_s13 }
   0x6   :  { %p102_p0 = scmp.ne.s32.totalorder %s25_s13, %s101_s14  ;;  %p107_p2 = scmp.lt.s32.totalorder %s101_s14, %s101_s14 }
   0x8   :  { %p108_p3 = por %p107_p2, %p106_p1 }
   0xa   :  { %p109_p4 = pnand %p108_p3, %p102_p0 }
   0xc   :  { %112 = shalt.err (!%p109_p4)
}
   0xd   :  { %27 = dma.hbm_to_vmem [thread:$0]  %s167_s1, 128, %s25_s13, [#allocation3]  }
   0xe   :  { %133 = dma.done.wait [#allocation5], 16  }
   0xf   :  { %134 = vsyncadd [#allocation5], 4294967280 }
  0x10   :  { %135 = dma.done.wait [#allocation3], 128  }
  0x11   :  { %136 = vsyncadd [#allocation3], 4294967168 }
  0x12   :  { %34 = sfence }
  0x13   :  { %s36_s0 = sld [smem:[#allocation2]]  ;;  %v35_v0 = vld [vmem:[#allocation6] sm:$0xff]  ;;  %s141_s21 = smov [#allocation7]  }
  0x14   :  { %s75_s17 = sld [smem:[#allocation2 + $0x1]]  ;;  %s65_s22 = sshll.u32 %s141_s21, 4  ;;  %s66_s22 = int_to_ptr.vmem [resolvable:$true] %s65_s22 }
  0x15   :  { %s76_s18 = sld [smem:[#allocation2 + $0x2]]  ;;  %s113_s23 = scalar_lea.vmem %s66_s22, 128 }
  0x16   :  { %s77_s19 = sld [smem:[#allocation2 + $0x3]]  ;;  %p114_p5 = scmp.ne.s32.totalorder %s66_s22, %s113_s23 }
  0x17   :  { %s78_s20 = sld [smem:[#allocation2 + $0x4]]  ;;  %p118_p6 = scmp.lt.s32.totalorder %s66_s22, %s66_s22 }
  0x18   :  { %s79_s1 = sld [smem:[#allocation2 + $0x5]]  ;;  %p119_p7 = scmp.lt.s32.totalorder %s113_s23, %s113_s23 }
  0x19   :  { %v42_v1 = vstv %s36_s0 }
  0x1a   :  { %v43_v2 = vmul.f32 %v42_v1, %v35_v0  ;;  %v44_v3 = vstv %s75_s17  ;;  %p120_p8 = por %p119_p7, %p118_p6 }
  0x1b   :  { %v47_v5 = vstv %s76_s18 }
  0x1c   :  { %v45_v4 = vadd.f32 %v44_v3, %v43_v2  ;;  %v49_v9 = vstv %s77_s19  ;;  %p121_p9 = pnand %p120_p8, %p114_p5 }
  0x1d   :  { %v50_v10 = vmul.f32 %v49_v9, %v35_v0  ;;  %v51_v11 = vstv %s78_s20 }
  0x1e   :  { %v46_v6 = vmul.f32 %v45_v4, %v35_v0  ;;  %v56_v14 = vstv %s79_s1 }
  0x1f   :  { %v52_v12 = vadd.f32 %v51_v11, %v50_v10 }
  0x20   :  { %v48_v7 = vadd.f32 %v47_v5, %v46_v6 }
  0x22   :  { %v53_v8 = vadd.f32 1.1920929e-07, %v48_v7 }
  0x24   :  { %83 = vrsqrt.f32 %v53_v8 }
  0x31   :  { %v84_v13 = vpop.eup %83 }
  0x32   :  { %v55_v15 = vmul.f32 %v84_v13, %v52_v12 }
  0x34   :  { %v57_v16 = vadd.f32 %v56_v14, %v55_v15 }
  0x36   :  { %58 = vst [vmem:[#allocation7] sm:$0xff] %v57_v16 }
  0x37   :  { %124 = shalt.err (!%p121_p9)
}
  0x38   :  { %68 = dma.vmem_to_hbm [thread:$0]  %s66_s22, 128, %s168_s2, [#allocation4]  }
  0x39   :  { %137 = dma.done.wait [#allocation4], 128  }
  0x3a   :  { %138 = vsyncadd [#allocation4], 4294967168 }
  0x3b   :  { %72 = vsyncpa [#allocation3], 1 }
  0x3c   :  { %73 = vsyncpa [#allocation4], 1 }
  0x3d   :  { %74 = vsyncpa [#allocation5], 1 }

</bundles_post_ra>
